<compile_context>
chip_gen: v5e
topology: v5e:2x2
jax: 0.10.0
libtpu: 0.0.40
codegen_flags: <defaults>
</compile_context>

<pallas_src>
import functools
from typing import NamedTuple, Tuple

import jax
import jax.numpy as jnp
from jax.experimental import pallas as pl
from jax.experimental.pallas import tpu as pltpu


def _round_up(x: int, m: int) -> int:
    return ((x + m - 1) // m) * m


def _physical_vmem_bytes() -> int:
    """Per-core VMEM capacity; conservative fallback if the query fails."""
    try:
        return int(pltpu.get_tpu_info().vmem_capacity_bytes)
    except Exception:
        return 64 * 1024 * 1024  # v7x per-TensorCore value (most restrictive)


# --------------------------------------------------------------------------
# Parameter preparation (done once; weight-stationary)
# --------------------------------------------------------------------------

class PreparedMLP(NamedTuple):
    weights: Tuple[jax.Array, ...]      # bf16, padded to (fi_p, fo_p)
    biases: Tuple[jax.Array, ...]       # f32,  padded to (1, fo_p)
    padded_dims: Tuple[Tuple[int, int], ...]
    in_features: int
    out_features: int
    compute_dtype: jnp.dtype


def prepare_params(params, compute_dtype=jnp.bfloat16) -> PreparedMLP:
    """Pad every (W, b) to 128-lane multiples and cast W to the compute dtype.

    Zero padding is exactly neutral: padded weight rows/cols and padded
    biases are 0, so padded lanes contribute exact zeros.
    """
    weights, biases, padded_dims = [], [], []
    for (w_t, b) in params:
        f_in, f_out = w_t.shape
        fi_p, fo_p = _round_up(f_in, 128), _round_up(f_out, 128)
        weights.append(
            jnp.pad(w_t, ((0, fi_p - f_in), (0, fo_p - f_out))).astype(compute_dtype))
        biases.append(
            jnp.pad(b, (0, fo_p - f_out)).astype(jnp.float32).reshape(1, fo_p))
        padded_dims.append((fi_p, fo_p))
    return PreparedMLP(
        weights=tuple(weights),
        biases=tuple(biases),
        padded_dims=tuple(padded_dims),
        in_features=params[0][0].shape[0],
        out_features=params[-1][0].shape[1],
        compute_dtype=jnp.dtype(compute_dtype),
    )


# --------------------------------------------------------------------------
# Kernel
# --------------------------------------------------------------------------

def _fused_mlp_kernel(*refs, num_layers: int, relu_flags):
    """refs = (x_ref, w0, b0, w1, b1, ..., w_{L-1}, b_{L-1}, o_ref).

    Chains all layers in-kernel; activations stay in vregs / VMEM.
    """
    x_ref = refs[0]
    o_ref = refs[-1]
    wb = refs[1:-1]

    x = x_ref[...]                                   # (bn, f0_pad), bf16
    for li in range(num_layers):
        w = wb[2 * li][...]                          # (fin_pad, fout_pad), bf16
        b = wb[2 * li + 1][...]                      # (1, fout_pad), f32
        y = jnp.dot(x, w, preferred_element_type=jnp.float32)   # MXU, f32 accum
        y = y + b                                    # bias + ReLU in f32 (VPU)
        if relu_flags[li]:
            y = jnp.maximum(y, 0.0)
        if li + 1 < num_layers:
            x = y.astype(w.dtype)                    # bf16 for next MXU pass
        else:
            # NOTE: padded batch rows (>= real n) hold bias/ReLU "garbage"
            # from all-zero inputs; the wrapper slices them off. Lane-dense
            # store (out_pad is a multiple of 128).
            o_ref[...] = y.astype(o_ref.dtype)


# --------------------------------------------------------------------------
# Launch helper
# --------------------------------------------------------------------------

def _launch(prepared: PreparedMLP, x_padded, n_pad, bn, out_pad, relu_flags,
            out_dtype, single_buffer_weights: bool):
    num_layers = len(prepared.weights)
    in_pad = x_padded.shape[1]
    out_bytes_per = jnp.dtype(out_dtype).itemsize
    w_bufs = 1 if single_buffer_weights else 2

    # ---- explicit VMEM budget from the actual resident footprint ----------
    w_bytes = sum(fi * fo * 2 for fi, fo in prepared.padded_dims) * w_bufs
    b_bytes = sum(8 * fo * 4 for _, fo in prepared.padded_dims) * w_bufs  # sublane-padded
    max_f = max([in_pad] + [fo for _, fo in prepared.padded_dims])
    x_bytes = 2 * bn * in_pad * 2                    # double-buffered bf16 input tile
    o_bytes = 2 * bn * out_pad * out_bytes_per       # double-buffered output tile
    scratch = 4 * bn * max_f * 4                     # f32 intermediates / compiler slack
    need = w_bytes + b_bytes + x_bytes + o_bytes + scratch
    vmem_limit = int(min(max(int(need * 1.25), 32 * 1024 * 1024),
                         int(_physical_vmem_bytes() * 0.98)))

    # ---- specs -------------------------------------------------------------
    def resident_spec(shape):
        idx = lambda i: (0,) * len(shape)
        if single_buffer_weights:
            # Constant index_map => block never revolves; a single buffer halves
            # the VMEM cost of resident weights.
            return pl.BlockSpec(shape, idx, pipeline_mode=pl.Buffered(1))
        return pl.BlockSpec(shape, idx)

    inputs = [x_padded]
    in_specs = [pl.BlockSpec((bn, in_pad), lambda i: (i, 0))]
    for w, b in zip(prepared.weights, prepared.biases):
        inputs.extend([w, b])
        in_specs.extend([resident_spec(w.shape), resident_spec(b.shape)])

    # ---- advisory cost estimate for XLA's scheduler ------------------------
    flops = 2 * n_pad * sum(fi * fo for fi, fo in prepared.padded_dims)
    bytes_accessed = (n_pad * in_pad * 2
                      + sum(fi * fo * 2 + fo * 4 for fi, fo in prepared.padded_dims)
                      + n_pad * out_pad * out_bytes_per)
    cost = pl.CostEstimate(flops=flops, transcendentals=0,
                           bytes_accessed=bytes_accessed)

    kernel = functools.partial(_fused_mlp_kernel,
                               num_layers=num_layers,
                               relu_flags=tuple(relu_flags))

    return pl.pallas_call(
        kernel,
        out_shape=jax.ShapeDtypeStruct((n_pad, out_pad), out_dtype),
        grid_spec=pltpu.PrefetchScalarGridSpec(
            num_scalar_prefetch=0,
            grid=(n_pad // bn,),
            in_specs=in_specs,
            out_specs=pl.BlockSpec((bn, out_pad), lambda i: (i, 0)),
        ),
        compiler_params=pltpu.CompilerParams(
            dimension_semantics=("parallel",),
            vmem_limit_bytes=vmem_limit),
        cost_estimate=cost,
    )(*inputs)


# --------------------------------------------------------------------------
# Public forward
# --------------------------------------------------------------------------

def mlp_forward(params, coords, *, outermost_linear: bool = False,
                block_rows: int | None = None,
                out_dtype=jnp.float32,
                compute_dtype=jnp.bfloat16):
    """coords: [N, in_features] -> [N, out_features] fused MLP forward.

    `params` may be a PreparedMLP (preferred: pad/cast done once) or a raw
    list of (W[in,out], b[out]) f32 pairs.
    """
    if not isinstance(params, PreparedMLP):
        params = prepare_params(params, compute_dtype=compute_dtype)

    n, in_f = coords.shape
    assert in_f == params.in_features, "coords feature dim mismatch"
    num_layers = len(params.weights)
    in_pad = params.padded_dims[0][0]
    out_pad = params.padded_dims[-1][1]
    out_bytes_per = jnp.dtype(out_dtype).itemsize

    # ---- adaptive batch tile: size bn from VMEM headroom -------------------
    # Worst case double-buffered weights (in case Buffered(1) is unsupported).
    w_resident = 2 * sum(fi * fo * 2 + 8 * fo * 4 for fi, fo in params.padded_dims)
    max_f = max([in_pad] + [fo for _, fo in params.padded_dims])
    per_row = 2 * in_pad * 2 + 2 * out_pad * out_bytes_per + 4 * max_f * 4
    budget = int(_physical_vmem_bytes() * 0.7)
    headroom = max(budget - w_resident, 0)
    bn_cap = headroom // max(per_row, 1)
    if block_rows is None:
        target = max(16, min(2048, (bn_cap // 128) * 128))
    else:
        target = max(16, block_rows)
    # 16-sublane alignment (bf16 packs [16,128] per vreg); never exceed the
    # (rounded-up) batch.
    bn = min(target, _round_up(max(n, 1), 16))
    bn = max(16, _round_up(bn, 16))
    n_pad = _round_up(n, bn)

    # ---- hot path only pads coords (weights already prepared) --------------
    x = coords
    if (x.dtype != params.compute_dtype) or (n_pad != n) or (in_pad != in_f):
        x = jnp.pad(coords, ((0, n_pad - n), (0, in_pad - in_f)))
        x = x.astype(params.compute_dtype)

    relu_flags = [not (li == num_layers - 1 and outermost_linear)
                  for li in range(num_layers)]

    try:
        out = _launch(params, x, n_pad, bn, out_pad, relu_flags, out_dtype,
                      single_buffer_weights=True)
    except Exception:
        # pl.Buffered(1) pipeline_mode unsupported on this jax/Mosaic build:
        # fall back to default double-buffered resident weights.
        out = _launch(params, x, n_pad, bn, out_pad, relu_flags, out_dtype,
                      single_buffer_weights=False)

    return out[:n, :params.out_features]


# --------------------------------------------------------------------------
# Init + reference
# --------------------------------------------------------------------------

def init_mlp_params(key, in_features, out_features, hidden_features,
                    num_hidden_layers):
    """Deterministic kaiming-normal (fan_in, relu) init; weights stored as [in, out]."""
    dims = ([in_features] + [hidden_features] * (num_hidden_layers + 1)
            + [out_features])
    params = []
    for i in range(len(dims) - 1):
        f_in, f_out = dims[i], dims[i + 1]
        key, wk = jax.random.split(key)
        std = (2.0 / f_in) ** 0.5                    # kaiming_normal_, relu, fan_in
        w_t = jax.random.normal(wk, (f_in, f_out), jnp.float32) * std
        b = jnp.zeros((f_out,), jnp.float32)
        params.append((w_t, b))
    return params


def _reference_forward(params, coords, *, outermost_linear=False,
                       compute_dtype=jnp.bfloat16):
    """Plain-JAX reference using the same bf16-in / f32-accum recipe.

    NOTE: results match this bf16 reference; a pure-f32 PyTorch module will
    diverge by more than 1e-3 for deep/wide nets (intentional tolerance).
    """
    x = coords.astype(compute_dtype)
    n_layers = len(params)
    for li, (w_t, b) in enumerate(params):
        y = jnp.dot(x, w_t.astype(compute_dtype),
                    preferred_element_type=jnp.float32) + b
        if not (li == n_layers - 1 and outermost_linear):
            y = jnp.maximum(y, 0.0)
        x = y.astype(compute_dtype) if li + 1 < n_layers else y
    return x


if __name__ == "__main__":
    in_features = 16
    out_features = 16
    hidden_features = 32
    num_hidden_layers = 2
    batch = 8

    key = jax.random.PRNGKey(0)
    key, xk = jax.random.split(key)
    coords = jax.random.normal(xk, (batch, in_features), jnp.float32)

    params = init_mlp_params(key, in_features, out_features,
                             hidden_features, num_hidden_layers)
    prepared = prepare_params(params)                # one-time pad/cast

    # outermost_linear=False path (final ReLU applied)
    out = mlp_forward(prepared, coords, outermost_linear=False)
    out = jax.block_until_ready(out)
    ref = _reference_forward(params, coords, outermost_linear=False)
    assert out.shape == (batch, out_features)
    assert jnp.allclose(out, ref, atol=1e-3, rtol=1e-3)

    # outermost_linear=True path (no final ReLU)
    out_lin = mlp_forward(prepared, coords, outermost_linear=True)
    out_lin = jax.block_until_ready(out_lin)
    ref_lin = _reference_forward(params, coords, outermost_linear=True)
    assert jnp.allclose(out_lin, ref_lin, atol=1e-3, rtol=1e-3)

    print("KERNEL_OK")
</pallas_src>

<mosaic_0001>
module attributes {stable_mosaic.version = 11 : i64} {
  func.func @_fused_mlp_kernel(%arg0: i32, %arg1: memref<16x128xbf16, #tpu.memory_space<vmem>>, %arg2: memref<128x128xbf16, #tpu.memory_space<vmem>>, %arg3: memref<1x128xf32, #tpu.memory_space<vmem>>, %arg4: memref<128x128xbf16, #tpu.memory_space<vmem>>, %arg5: memref<1x128xf32, #tpu.memory_space<vmem>>, %arg6: memref<128x128xbf16, #tpu.memory_space<vmem>>, %arg7: memref<1x128xf32, #tpu.memory_space<vmem>>, %arg8: memref<128x128xbf16, #tpu.memory_space<vmem>>, %arg9: memref<1x128xf32, #tpu.memory_space<vmem>>, %arg10: memref<16x128xf32, #tpu.memory_space<vmem>>) attributes {dimension_semantics = [#tpu.dimension_semantics<parallel>], iteration_bounds = array<i64: 1>, scalar_prefetch = 0 : i64, scratch_operands = 0 : i64, tpu.core_type = #tpu.core_type<tc>, window_params = [{transform_indices = @transform_0, window_bounds = array<i64: 16, 128>}, {pipeline_mode = #tpu.pipeline_mode<synchronous>, transform_indices = @transform_1, window_bounds = array<i64: 128, 128>}, {pipeline_mode = #tpu.pipeline_mode<synchronous>, transform_indices = @transform_2, window_bounds = array<i64: 1, 128>}, {pipeline_mode = #tpu.pipeline_mode<synchronous>, transform_indices = @transform_3, window_bounds = array<i64: 128, 128>}, {pipeline_mode = #tpu.pipeline_mode<synchronous>, transform_indices = @transform_4, window_bounds = array<i64: 1, 128>}, {pipeline_mode = #tpu.pipeline_mode<synchronous>, transform_indices = @transform_5, window_bounds = array<i64: 128, 128>}, {pipeline_mode = #tpu.pipeline_mode<synchronous>, transform_indices = @transform_6, window_bounds = array<i64: 1, 128>}, {pipeline_mode = #tpu.pipeline_mode<synchronous>, transform_indices = @transform_7, window_bounds = array<i64: 128, 128>}, {pipeline_mode = #tpu.pipeline_mode<synchronous>, transform_indices = @transform_8, window_bounds = array<i64: 1, 128>}, {transform_indices = @transform_9, window_bounds = array<i64: 16, 128>}]} {
    %c0 = arith.constant 0 : index
    %c0_0 = arith.constant 0 : index
    %0 = vector.load %arg1[%c0, %c0_0] : memref<16x128xbf16, #tpu.memory_space<vmem>>, vector<16x128xbf16>
    %c0_1 = arith.constant 0 : index
    %c0_2 = arith.constant 0 : index
    %1 = vector.load %arg2[%c0_1, %c0_2] : memref<128x128xbf16, #tpu.memory_space<vmem>>, vector<128x128xbf16>
    %c0_3 = arith.constant 0 : index
    %c0_4 = arith.constant 0 : index
    %2 = vector.load %arg3[%c0_3, %c0_4] : memref<1x128xf32, #tpu.memory_space<vmem>>, vector<1x128xf32>
    %cst = arith.constant dense<0.000000e+00> : vector<16x128xf32>
    %3 = tpu.matmul %0, %1, %cst {dimension_numbers = #tpu.dot_dimension_numbers<[1], [0], [0], [1], [0, 0, 1, 1], [], []>} : vector<16x128xbf16>, vector<128x128xbf16>, vector<16x128xf32> -> vector<16x128xf32>
    %4 = vector.broadcast %2 : vector<1x128xf32> to vector<16x128xf32>
    %5 = arith.addf %3, %4 : vector<16x128xf32>
    %cst_5 = arith.constant 0.000000e+00 : f32
    %6 = vector.broadcast %cst_5 : f32 to vector<16x128xf32>
    %7 = arith.maximumf %5, %6 : vector<16x128xf32>
    %8 = arith.truncf %7 : vector<16x128xf32> to vector<16x128xbf16>
    %c0_6 = arith.constant 0 : index
    %c0_7 = arith.constant 0 : index
    %9 = vector.load %arg4[%c0_6, %c0_7] : memref<128x128xbf16, #tpu.memory_space<vmem>>, vector<128x128xbf16>
    %c0_8 = arith.constant 0 : index
    %c0_9 = arith.constant 0 : index
    %10 = vector.load %arg5[%c0_8, %c0_9] : memref<1x128xf32, #tpu.memory_space<vmem>>, vector<1x128xf32>
    %cst_10 = arith.constant dense<0.000000e+00> : vector<16x128xf32>
    %11 = tpu.matmul %8, %9, %cst_10 {dimension_numbers = #tpu.dot_dimension_numbers<[1], [0], [0], [1], [0, 0, 1, 1], [], []>} : vector<16x128xbf16>, vector<128x128xbf16>, vector<16x128xf32> -> vector<16x128xf32>
    %12 = vector.broadcast %10 : vector<1x128xf32> to vector<16x128xf32>
    %13 = arith.addf %11, %12 : vector<16x128xf32>
    %cst_11 = arith.constant 0.000000e+00 : f32
    %14 = vector.broadcast %cst_11 : f32 to vector<16x128xf32>
    %15 = arith.maximumf %13, %14 : vector<16x128xf32>
    %16 = arith.truncf %15 : vector<16x128xf32> to vector<16x128xbf16>
    %c0_12 = arith.constant 0 : index
    %c0_13 = arith.constant 0 : index
    %17 = vector.load %arg6[%c0_12, %c0_13] : memref<128x128xbf16, #tpu.memory_space<vmem>>, vector<128x128xbf16>
    %c0_14 = arith.constant 0 : index
    %c0_15 = arith.constant 0 : index
    %18 = vector.load %arg7[%c0_14, %c0_15] : memref<1x128xf32, #tpu.memory_space<vmem>>, vector<1x128xf32>
    %cst_16 = arith.constant dense<0.000000e+00> : vector<16x128xf32>
    %19 = tpu.matmul %16, %17, %cst_16 {dimension_numbers = #tpu.dot_dimension_numbers<[1], [0], [0], [1], [0, 0, 1, 1], [], []>} : vector<16x128xbf16>, vector<128x128xbf16>, vector<16x128xf32> -> vector<16x128xf32>
    %20 = vector.broadcast %18 : vector<1x128xf32> to vector<16x128xf32>
    %21 = arith.addf %19, %20 : vector<16x128xf32>
    %cst_17 = arith.constant 0.000000e+00 : f32
    %22 = vector.broadcast %cst_17 : f32 to vector<16x128xf32>
    %23 = arith.maximumf %21, %22 : vector<16x128xf32>
    %24 = arith.truncf %23 : vector<16x128xf32> to vector<16x128xbf16>
    %c0_18 = arith.constant 0 : index
    %c0_19 = arith.constant 0 : index
    %25 = vector.load %arg8[%c0_18, %c0_19] : memref<128x128xbf16, #tpu.memory_space<vmem>>, vector<128x128xbf16>
    %c0_20 = arith.constant 0 : index
    %c0_21 = arith.constant 0 : index
    %26 = vector.load %arg9[%c0_20, %c0_21] : memref<1x128xf32, #tpu.memory_space<vmem>>, vector<1x128xf32>
    %cst_22 = arith.constant dense<0.000000e+00> : vector<16x128xf32>
    %27 = tpu.matmul %24, %25, %cst_22 {dimension_numbers = #tpu.dot_dimension_numbers<[1], [0], [0], [1], [0, 0, 1, 1], [], []>} : vector<16x128xbf16>, vector<128x128xbf16>, vector<16x128xf32> -> vector<16x128xf32>
    %28 = vector.broadcast %26 : vector<1x128xf32> to vector<16x128xf32>
    %29 = arith.addf %27, %28 : vector<16x128xf32>
    %cst_23 = arith.constant 0.000000e+00 : f32
    %30 = vector.broadcast %cst_23 : f32 to vector<16x128xf32>
    %31 = arith.maximumf %29, %30 : vector<16x128xf32>
    %c0_24 = arith.constant 0 : index
    %c0_25 = arith.constant 0 : index
    %32 = vector.load %arg10[%c0_24, %c0_25] : memref<16x128xf32, #tpu.memory_space<vmem>>, vector<16x128xf32>
    tpu.vector_store %arg10[%c0_24, %c0_25], %31 {strides = array<i32>} : memref<16x128xf32, #tpu.memory_space<vmem>>, vector<16x128xf32>,
    return
  }
  func.func @transform_0(%arg0: i32) -> (i32, i32) {
    %c0_i32 = arith.constant 0 : i32
    %c0_i32_0 = arith.constant 0 : i32
    return %arg0, %c0_i32 : i32, i32
  }
  func.func @transform_1(%arg0: i32) -> (i32, i32) {
    %c0_i32 = arith.constant 0 : i32
    %c0_i32_0 = arith.constant 0 : i32
    %c0_i32_1 = arith.constant 0 : i32
    return %c0_i32, %c0_i32_0 : i32, i32
  }
  func.func @transform_2(%arg0: i32) -> (i32, i32) {
    %c0_i32 = arith.constant 0 : i32
    %c0_i32_0 = arith.constant 0 : i32
    %c0_i32_1 = arith.constant 0 : i32
    return %c0_i32, %c0_i32_0 : i32, i32
  }
  func.func @transform_3(%arg0: i32) -> (i32, i32) {
    %c0_i32 = arith.constant 0 : i32
    %c0_i32_0 = arith.constant 0 : i32
    %c0_i32_1 = arith.constant 0 : i32
    return %c0_i32, %c0_i32_0 : i32, i32
  }
  func.func @transform_4(%arg0: i32) -> (i32, i32) {
    %c0_i32 = arith.constant 0 : i32
    %c0_i32_0 = arith.constant 0 : i32
    %c0_i32_1 = arith.constant 0 : i32
    return %c0_i32, %c0_i32_0 : i32, i32
  }
  func.func @transform_5(%arg0: i32) -> (i32, i32) {
    %c0_i32 = arith.constant 0 : i32
    %c0_i32_0 = arith.constant 0 : i32
    %c0_i32_1 = arith.constant 0 : i32
    return %c0_i32, %c0_i32_0 : i32, i32
  }
  func.func @transform_6(%arg0: i32) -> (i32, i32) {
    %c0_i32 = arith.constant 0 : i32
    %c0_i32_0 = arith.constant 0 : i32
    %c0_i32_1 = arith.constant 0 : i32
    return %c0_i32, %c0_i32_0 : i32, i32
  }
  func.func @transform_7(%arg0: i32) -> (i32, i32) {
    %c0_i32 = arith.constant 0 : i32
    %c0_i32_0 = arith.constant 0 : i32
    %c0_i32_1 = arith.constant 0 : i32
    return %c0_i32, %c0_i32_0 : i32, i32
  }
  func.func @transform_8(%arg0: i32) -> (i32, i32) {
    %c0_i32 = arith.constant 0 : i32
    %c0_i32_0 = arith.constant 0 : i32
    %c0_i32_1 = arith.constant 0 : i32
    return %c0_i32, %c0_i32_0 : i32, i32
  }
  func.func @transform_9(%arg0: i32) -> (i32, i32) {
    %c0_i32 = arith.constant 0 : i32
    %c0_i32_0 = arith.constant 0 : i32
    return %arg0, %c0_i32 : i32, i32
  }
}

module attributes {stable_mosaic.version = 11 : i64} {
  func.func @_fused_mlp_kernel(%arg0: i32, %arg1: memref<16x128xbf16, #tpu.memory_space<vmem>>, %arg2: memref<128x128xbf16, #tpu.memory_space<vmem>>, %arg3: memref<1x128xf32, #tpu.memory_space<vmem>>, %arg4: memref<128x128xbf16, #tpu.memory_space<vmem>>, %arg5: memref<1x128xf32, #tpu.memory_space<vmem>>, %arg6: memref<128x128xbf16, #tpu.memory_space<vmem>>, %arg7: memref<1x128xf32, #tpu.memory_space<vmem>>, %arg8: memref<128x128xbf16, #tpu.memory_space<vmem>>, %arg9: memref<1x128xf32, #tpu.memory_space<vmem>>, %arg10: memref<16x128xf32, #tpu.memory_space<vmem>>) attributes {dimension_semantics = [#tpu.dimension_semantics<parallel>], iteration_bounds = array<i64: 1>, scalar_prefetch = 0 : i64, scratch_operands = 0 : i64, tpu.core_type = #tpu.core_type<tc>, window_params = [{transform_indices = @transform_0, window_bounds = array<i64: 16, 128>}, {pipeline_mode = #tpu.pipeline_mode<synchronous>, transform_indices = @transform_1, window_bounds = array<i64: 128, 128>}, {pipeline_mode = #tpu.pipeline_mode<synchronous>, transform_indices = @transform_2, window_bounds = array<i64: 1, 128>}, {pipeline_mode = #tpu.pipeline_mode<synchronous>, transform_indices = @transform_3, window_bounds = array<i64: 128, 128>}, {pipeline_mode = #tpu.pipeline_mode<synchronous>, transform_indices = @transform_4, window_bounds = array<i64: 1, 128>}, {pipeline_mode = #tpu.pipeline_mode<synchronous>, transform_indices = @transform_5, window_bounds = array<i64: 128, 128>}, {pipeline_mode = #tpu.pipeline_mode<synchronous>, transform_indices = @transform_6, window_bounds = array<i64: 1, 128>}, {pipeline_mode = #tpu.pipeline_mode<synchronous>, transform_indices = @transform_7, window_bounds = array<i64: 128, 128>}, {pipeline_mode = #tpu.pipeline_mode<synchronous>, transform_indices = @transform_8, window_bounds = array<i64: 1, 128>}, {transform_indices = @transform_9, window_bounds = array<i64: 16, 128>}]} {
    %c0 = arith.constant 0 : index
    %c0_0 = arith.constant 0 : index
    %0 = vector.load %arg1[%c0, %c0_0] : memref<16x128xbf16, #tpu.memory_space<vmem>>, vector<16x128xbf16>
    %c0_1 = arith.constant 0 : index
    %c0_2 = arith.constant 0 : index
    %1 = vector.load %arg2[%c0_1, %c0_2] : memref<128x128xbf16, #tpu.memory_space<vmem>>, vector<128x128xbf16>
    %c0_3 = arith.constant 0 : index
    %c0_4 = arith.constant 0 : index
    %2 = vector.load %arg3[%c0_3, %c0_4] : memref<1x128xf32, #tpu.memory_space<vmem>>, vector<1x128xf32>
    %cst = arith.constant dense<0.000000e+00> : vector<16x128xf32>
    %3 = tpu.matmul %0, %1, %cst {dimension_numbers = #tpu.dot_dimension_numbers<[1], [0], [0], [1], [0, 0, 1, 1], [], []>} : vector<16x128xbf16>, vector<128x128xbf16>, vector<16x128xf32> -> vector<16x128xf32>
    %4 = vector.broadcast %2 : vector<1x128xf32> to vector<16x128xf32>
    %5 = arith.addf %3, %4 : vector<16x128xf32>
    %cst_5 = arith.constant 0.000000e+00 : f32
    %6 = vector.broadcast %cst_5 : f32 to vector<16x128xf32>
    %7 = arith.maximumf %5, %6 : vector<16x128xf32>
    %8 = arith.truncf %7 : vector<16x128xf32> to vector<16x128xbf16>
    %c0_6 = arith.constant 0 : index
    %c0_7 = arith.constant 0 : index
    %9 = vector.load %arg4[%c0_6, %c0_7] : memref<128x128xbf16, #tpu.memory_space<vmem>>, vector<128x128xbf16>
    %c0_8 = arith.constant 0 : index
    %c0_9 = arith.constant 0 : index
    %10 = vector.load %arg5[%c0_8, %c0_9] : memref<1x128xf32, #tpu.memory_space<vmem>>, vector<1x128xf32>
    %cst_10 = arith.constant dense<0.000000e+00> : vector<16x128xf32>
    %11 = tpu.matmul %8, %9, %cst_10 {dimension_numbers = #tpu.dot_dimension_numbers<[1], [0], [0], [1], [0, 0, 1, 1], [], []>} : vector<16x128xbf16>, vector<128x128xbf16>, vector<16x128xf32> -> vector<16x128xf32>
    %12 = vector.broadcast %10 : vector<1x128xf32> to vector<16x128xf32>
    %13 = arith.addf %11, %12 : vector<16x128xf32>
    %cst_11 = arith.constant 0.000000e+00 : f32
    %14 = vector.broadcast %cst_11 : f32 to vector<16x128xf32>
    %15 = arith.maximumf %13, %14 : vector<16x128xf32>
    %16 = arith.truncf %15 : vector<16x128xf32> to vector<16x128xbf16>
    %c0_12 = arith.constant 0 : index
    %c0_13 = arith.constant 0 : index
    %17 = vector.load %arg6[%c0_12, %c0_13] : memref<128x128xbf16, #tpu.memory_space<vmem>>, vector<128x128xbf16>
    %c0_14 = arith.constant 0 : index
    %c0_15 = arith.constant 0 : index
    %18 = vector.load %arg7[%c0_14, %c0_15] : memref<1x128xf32, #tpu.memory_space<vmem>>, vector<1x128xf32>
    %cst_16 = arith.constant dense<0.000000e+00> : vector<16x128xf32>
    %19 = tpu.matmul %16, %17, %cst_16 {dimension_numbers = #tpu.dot_dimension_numbers<[1], [0], [0], [1], [0, 0, 1, 1], [], []>} : vector<16x128xbf16>, vector<128x128xbf16>, vector<16x128xf32> -> vector<16x128xf32>
    %20 = vector.broadcast %18 : vector<1x128xf32> to vector<16x128xf32>
    %21 = arith.addf %19, %20 : vector<16x128xf32>
    %cst_17 = arith.constant 0.000000e+00 : f32
    %22 = vector.broadcast %cst_17 : f32 to vector<16x128xf32>
    %23 = arith.maximumf %21, %22 : vector<16x128xf32>
    %24 = arith.truncf %23 : vector<16x128xf32> to vector<16x128xbf16>
    %c0_18 = arith.constant 0 : index
    %c0_19 = arith.constant 0 : index
    %25 = vector.load %arg8[%c0_18, %c0_19] : memref<128x128xbf16, #tpu.memory_space<vmem>>, vector<128x128xbf16>
    %c0_20 = arith.constant 0 : index
    %c0_21 = arith.constant 0 : index
    %26 = vector.load %arg9[%c0_20, %c0_21] : memref<1x128xf32, #tpu.memory_space<vmem>>, vector<1x128xf32>
    %cst_22 = arith.constant dense<0.000000e+00> : vector<16x128xf32>
    %27 = tpu.matmul %24, %25, %cst_22 {dimension_numbers = #tpu.dot_dimension_numbers<[1], [0], [0], [1], [0, 0, 1, 1], [], []>} : vector<16x128xbf16>, vector<128x128xbf16>, vector<16x128xf32> -> vector<16x128xf32>
    %28 = vector.broadcast %26 : vector<1x128xf32> to vector<16x128xf32>
    %29 = arith.addf %27, %28 : vector<16x128xf32>
    %cst_23 = arith.constant 0.000000e+00 : f32
    %30 = vector.broadcast %cst_23 : f32 to vector<16x128xf32>
    %31 = arith.maximumf %29, %30 : vector<16x128xf32>
    %c0_24 = arith.constant 0 : index
    %c0_25 = arith.constant 0 : index
    %32 = vector.load %arg10[%c0_24, %c0_25] : memref<16x128xf32, #tpu.memory_space<vmem>>, vector<16x128xf32>
    tpu.vector_store %arg10[%c0_24, %c0_25], %31 {strides = array<i32>} : memref<16x128xf32, #tpu.memory_space<vmem>>, vector<16x128xf32>,
    return
  }
  func.func @transform_0(%arg0: i32) -> (i32, i32) {
    %c0_i32 = arith.constant 0 : i32
    %c0_i32_0 = arith.constant 0 : i32
    return %arg0, %c0_i32 : i32, i32
  }
  func.func @transform_1(%arg0: i32) -> (i32, i32) {
    %c0_i32 = arith.constant 0 : i32
    %c0_i32_0 = arith.constant 0 : i32
    %c0_i32_1 = arith.constant 0 : i32
    return %c0_i32, %c0_i32_0 : i32, i32
  }
  func.func @transform_2(%arg0: i32) -> (i32, i32) {
    %c0_i32 = arith.constant 0 : i32
    %c0_i32_0 = arith.constant 0 : i32
    %c0_i32_1 = arith.constant 0 : i32
    return %c0_i32, %c0_i32_0 : i32, i32
  }
  func.func @transform_3(%arg0: i32) -> (i32, i32) {
    %c0_i32 = arith.constant 0 : i32
    %c0_i32_0 = arith.constant 0 : i32
    %c0_i32_1 = arith.constant 0 : i32
    return %c0_i32, %c0_i32_0 : i32, i32
  }
  func.func @transform_4(%arg0: i32) -> (i32, i32) {
    %c0_i32 = arith.constant 0 : i32
    %c0_i32_0 = arith.constant 0 : i32
    %c0_i32_1 = arith.constant 0 : i32
    return %c0_i32, %c0_i32_0 : i32, i32
  }
  func.func @transform_5(%arg0: i32) -> (i32, i32) {
    %c0_i32 = arith.constant 0 : i32
    %c0_i32_0 = arith.constant 0 : i32
    %c0_i32_1 = arith.constant 0 : i32
    return %c0_i32, %c0_i32_0 : i32, i32
  }
  func.func @transform_6(%arg0: i32) -> (i32, i32) {
    %c0_i32 = arith.constant 0 : i32
    %c0_i32_0 = arith.constant 0 : i32
    %c0_i32_1 = arith.constant 0 : i32
    return %c0_i32, %c0_i32_0 : i32, i32
  }
  func.func @transform_7(%arg0: i32) -> (i32, i32) {
    %c0_i32 = arith.constant 0 : i32
    %c0_i32_0 = arith.constant 0 : i32
    %c0_i32_1 = arith.constant 0 : i32
    return %c0_i32, %c0_i32_0 : i32, i32
  }
  func.func @transform_8(%arg0: i32) -> (i32, i32) {
    %c0_i32 = arith.constant 0 : i32
    %c0_i32_0 = arith.constant 0 : i32
    %c0_i32_1 = arith.constant 0 : i32
    return %c0_i32, %c0_i32_0 : i32, i32
  }
  func.func @transform_9(%arg0: i32) -> (i32, i32) {
    %c0_i32 = arith.constant 0 : i32
    %c0_i32_0 = arith.constant 0 : i32
    return %arg0, %c0_i32 : i32, i32
  }
}

</mosaic_0001>

<bundles_post_ra>
// kernel: tpu_custom_call.1
= control target key start
LH: loop header
LB: loop body
LE: loop exit
PB: predicated region body
PF: predicated region fallthrough
CT: control target
= control target key end

     0   :  { %14 = vsyncpa [#allocation3], 0  ;;  %s902_s0 = inlined_call_operand.hbm [shape: bf16[16,128], index: 0, kind: input, shape index: {}]   ;;  %s903_s1 = inlined_call_operand.hbm [shape: bf16[128,128], index: 1, kind: input, shape index: {}]   ;;  %s904_s2 = inlined_call_operand.vmem [shape: f32[1,128], index: 2, kind: input, shape index: {}]   ;;  %s905_s3 = inlined_call_operand.hbm [shape: bf16[128,128], index: 3, kind: input, shape index: {}]   ;;  %s906_s4 = inlined_call_operand.vmem [shape: f32[1,128], index: 4, kind: input, shape index: {}]   ;;  %s907_s5 = inlined_call_operand.hbm [shape: bf16[128,128], index: 5, kind: input, shape index: {}]   ;;  %s908_s6 = inlined_call_operand.vmem [shape: f32[1,128], index: 6, kind: input, shape index: {}]   ;;  %s909_s7 = inlined_call_operand.hbm [shape: bf16[128,128], index: 7, kind: input, shape index: {}]   ;;  %s910_s8 = inlined_call_operand.vmem [shape: f32[1,128], index: 8, kind: input, shape index: {}]   ;;  %s911_s9 = inlined_call_operand.hbm [shape: f32[16,128], index: 9, kind: output, shape index: {}]  }
   0x1   :  { %15 = vsyncpa [#allocation6], 0 }
   0x2   :  { %16 = vsyncpa [#allocation9], 0 }
   0x3   :  { %17 = vsyncpa [#allocation4], 0  ;;  %s35_s11 = sshll.u32 %s903_s1, 4  ;;  %s812_s12 = smov [#allocation5]   ;;  %s36_s11 = int_to_ptr.hbm [resolvable:$true] %s35_s11 }
   0x4   :  { %s37_s13 = sshll.u32 %s812_s12, 4  ;;  %s65_s16 = sshll.u32 %s907_s5, 4  ;;  %s38_s13 = int_to_ptr.vmem [resolvable:$true] %s37_s13  ;;  %s66_s16 = int_to_ptr.hbm [resolvable:$true] %s65_s16 }
   0x5   :  { %s813_s17 = smov 64   ;;  %s814_s18 = smov 4  }
   0x6   :  { %43 = dma.hbm_to_vmem [thread:$0]  %s36_s11, 1024, %s38_s13, [#allocation6], %s813_s17, %s813_s17, %s814_s18  }
   0x7   :  { %s815_s19 = smov [#allocation8]   ;;  %s22_s23 = sshll.u32 %s902_s0, 4  ;;  %s23_s23 = int_to_ptr.hbm [resolvable:$true] %s22_s23 }
   0x8   :  { %s67_s20 = sshll.u32 %s815_s19, 4  ;;  %s50_s25 = sshll.u32 %s905_s3, 4  ;;  %s68_s20 = int_to_ptr.vmem [resolvable:$true] %s67_s20  ;;  %s51_s25 = int_to_ptr.hbm [resolvable:$true] %s50_s25 }
   0x9   :  { %73 = dma.hbm_to_vmem [thread:$0]  %s66_s16, 1024, %s68_s20, [#allocation9], %s813_s17, %s813_s17, %s814_s18  }
   0xa   :  { %s816_s26 = smov [#allocation2]   ;;  %s817_s5 = smov [#allocation7]  }
   0xb   :  { %s24_s27 = sshll.u32 %s816_s26, 4  ;;  %s52_s28 = sshll.u32 %s817_s5, 4  ;;  %s25_s27 = int_to_ptr.vmem [resolvable:$true] %s24_s27  ;;  %s53_s28 = int_to_ptr.vmem [resolvable:$true] %s52_s28 }
   0xc   :  { %30 = dma.hbm_to_vmem [thread:$0]  %s23_s23, 128, %s25_s27, [#allocation3], %s813_s17, %s813_s17, %s814_s18  }
   0xd   :  { %s80_s10 = sshll.u32 %s909_s7, 4  ;;  %s818_s0 = smov [#allocation10]   ;;  %s81_s10 = int_to_ptr.hbm [resolvable:$true] %s80_s10 }
   0xe   :  { %58 = dma.hbm_to_vmem [thread:$0]  %s51_s25, 1024, %s53_s28, [#allocation6], %s813_s17, %s813_s17, %s814_s18  }
   0xf   :  { %s82_s11 = sshll.u32 %s818_s0, 4  ;;  %s83_s11 = int_to_ptr.vmem [resolvable:$true] %s82_s11 }
  0x10   :  { %88 = dma.hbm_to_vmem [thread:$0]  %s81_s10, 1024, %s83_s11, [#allocation9], %s813_s17, %s813_s17, %s814_s18  }
  0x11   :  { %804 = dma.done.wait [#allocation3], 128  }
  0x12   :  { %805 = vsyncadd [#allocation3], 4294967168 }
  0x13   :  { %806 = dma.done.wait [#allocation6], 2048  }
  0x14   :  { %807 = vsyncadd [#allocation6], 4294965248 }
  0x15   :  { %808 = dma.done.wait [#allocation9], 2048  }
  0x16   :  { %809 = vsyncadd [#allocation9], 4294965248  ;;  %v621_v0 = vld [vmem:[#allocation5 + $0x38] sm:$0xff]  ;;  %v620_v1 = vld [vmem:[#allocation5 + $0x30] sm:$0xff]  ;;  %s819_s16 = smov [#allocation11]   ;;  %s820_s20 = smov 128  }
  0x17   :  { %187 = vmatpush.bf16.msra.mxu0 %v621_v0  ;;  %v629_v2 = vld [vmem:[#allocation7 + $0x38] sm:$0xff]  ;;  %v628_v3 = vld [vmem:[#allocation7 + $0x30] sm:$0xff]  ;;  %v619_v4 = vld [vmem:[#allocation5 + $0x28] sm:$0xff]  ;;  %s464_s17 = sshll.u32 %s819_s16, 4  ;;  %s821_s21 = smov 8   ;;  %s465_s17 = int_to_ptr.vmem [resolvable:$true] %s464_s17 }
  0x18   :  { %272 = vmatpush.bf16.msra.mxu1 %v629_v2  ;;  %v627_v5 = vld [vmem:[#allocation7 + $0x28] sm:$0xff]  ;;  %v618_v6 = vld [vmem:[#allocation5 + $0x20] sm:$0xff]  ;;  %v617_v8 = vld [vmem:[#allocation5 + $0x18] sm:$0xff] }
  0x19   :  { %v626_v7 = vld [vmem:[#allocation7 + $0x20] sm:$0xff]  ;;  %v616_v9 = vld [vmem:[#allocation5 + $0x10] sm:$0xff]  ;;  %v615_v10 = vld [vmem:[#allocation5 + $0x8] sm:$0xff] }
  0x1a   :  { %v614_v11 = vld [vmem:[#allocation5] sm:$0xff]  ;;  %v613_v12 = vld [vmem:[#allocation2] sm:$0xff]  ;;  %v624_v14 = vld [vmem:[#allocation7 + $0x10] sm:$0xff] }
  0x1b   :  { %188 = vmatpush.bf16.msra.mxu0 %v620_v1  ;;  %v625_v13 = vld [vmem:[#allocation7 + $0x18] sm:$0xff]  ;;  %v623_v15 = vld [vmem:[#allocation7 + $0x8] sm:$0xff]  ;;  %v622_v16 = vld [vmem:[#allocation7] sm:$0xff] }
  0x1c   :  { %273 = vmatpush.bf16.msra.mxu1 %v628_v3  ;;  %v637_v17 = vld [vmem:[#allocation8 + $0x38] sm:$0xff]  ;;  %v636_v18 = vld [vmem:[#allocation8 + $0x30] sm:$0xff]  ;;  %v635_v19 = vld [vmem:[#allocation8 + $0x28] sm:$0xff] }
  0x1d   :  { %357 = vmatpush.bf16.msra.mxu2 %v637_v17  ;;  %v634_v20 = vld [vmem:[#allocation8 + $0x20] sm:$0xff]  ;;  %v656_v22 = vld [vmem:[%s904_s2] ss:$0 sm:$0xff]  ;;  %v632_v30 = vld [vmem:[#allocation8 + $0x10] sm:$0xff] }
  0x1e   :  { %v633_v29 = vld [vmem:[#allocation8 + $0x18] sm:$0xff]  ;;  %v631_v31 = vld [vmem:[#allocation8 + $0x8] sm:$0xff]  ;;  %v630_v32 = vld [vmem:[#allocation8] sm:$0xff] }
  0x1f   :  { %189 = vmatpush.bf16.msra.mxu0 %v619_v4  ;;  %v645_v33 = vld [vmem:[#allocation10 + $0x38] sm:$0xff]  ;;  %v644_v34 = vld [vmem:[#allocation10 + $0x30] sm:$0xff]  ;;  %v643_v35 = vld [vmem:[#allocation10 + $0x28] sm:$0xff] }
  0x20   :  { %274 = vmatpush.bf16.msra.mxu1 %v627_v5  ;;  %442 = vmatpush.bf16.msra.mxu3 %v645_v33  ;;  %v642_v36 = vld [vmem:[#allocation10 + $0x20] sm:$0xff]  ;;  %v657_v38 = vld [vmem:[%s906_s4] ss:$0 sm:$0xff]  ;;  %v640_v46 = vld [vmem:[#allocation10 + $0x10] sm:$0xff] }
  0x21   :  { %358 = vmatpush.bf16.msra.mxu2 %v636_v18  ;;  %v641_v45 = vld [vmem:[#allocation10 + $0x18] sm:$0xff]  ;;  %v639_v47 = vld [vmem:[#allocation10 + $0x8] sm:$0xff]  ;;  %v638_v48 = vld [vmem:[#allocation10] sm:$0xff] }
  0x22   :  { %v658_v50 = vld [vmem:[%s908_s6] ss:$0 sm:$0xff]  ;;  %s466_s6 = sshll.u32 %s911_s9, 4  ;;  %s467_s6 = int_to_ptr.hbm [resolvable:$true] %s466_s6 }
  0x23   :  { %190 = vmatpush.bf16.msra.mxu0 %v618_v6  ;;  %v659_v57 = vld [vmem:[%s910_s8] ss:$0 sm:$0xff] }
  0x24   :  { %275 = vmatpush.bf16.msra.mxu1 %v626_v7  ;;  %443 = vmatpush.bf16.msra.mxu3 %v644_v34 }
  0x25   :  { %359 = vmatpush.bf16.msra.mxu2 %v635_v19 }
  0x27   :  { %191 = vmatpush.bf16.msra.mxu0 %v617_v8 }
  0x28   :  { %276 = vmatpush.bf16.msra.mxu1 %v625_v13  ;;  %444 = vmatpush.bf16.msra.mxu3 %v643_v35 }
  0x29   :  { %360 = vmatpush.bf16.msra.mxu2 %v634_v20 }
  0x2b   :  { %192 = vmatpush.bf16.msra.mxu0 %v616_v9 }
  0x2c   :  { %277 = vmatpush.bf16.msra.mxu1 %v624_v14  ;;  %445 = vmatpush.bf16.msra.mxu3 %v642_v36 }
  0x2d   :  { %361 = vmatpush.bf16.msra.mxu2 %v633_v29 }
  0x2f   :  { %193 = vmatpush.bf16.msra.mxu0 %v615_v10 }
  0x30   :  { %278 = vmatpush.bf16.msra.mxu1 %v623_v15  ;;  %446 = vmatpush.bf16.msra.mxu3 %v641_v45 }
  0x31   :  { %362 = vmatpush.bf16.msra.mxu2 %v632_v30 }
  0x33   :  { %194 = vmatpush.bf16.msra.mxu0 %v614_v11 }
  0x34   :  { %279 = vmatpush.bf16.msra.mxu1 %v622_v16  ;;  %447 = vmatpush.bf16.msra.mxu3 %v640_v46 }
  0x35   :  { %363 = vmatpush.bf16.msra.mxu2 %v631_v31 }
  0x36   :  { %195 = vmatmul.bf16.vlgmr.msra.gmra.mxu0 %v613_v12 }
  0x38   :  { %448 = vmatpush.bf16.msra.mxu3 %v639_v47 }
  0x39   :  { %364 = vmatpush.bf16.msra.mxu2 %v630_v32 }
  0x3c   :  { %449 = vmatpush.bf16.msra.mxu3 %v638_v48 }
  0xb3   :  { %v196_v21 = vpop.f32.mrf.mxu0 }
  0xb4   :  { %v197_v23 = vadd.f32 %v656_v22, %v196_v21 }
  0xb6   :  { %v201_v26 = vmax.f32 %v197_v23, 0.0 }
  0xbb   :  { %v198_v24 = vpop.f32.mrf.mxu0 }
  0xbc   :  { %v199_v25 = vadd.f32 %v656_v22, %v198_v24 }
  0xbe   :  { %v202_v27 = vmax.f32 %v199_v25, 0.0 }
  0xc0   :  { %v203_v28 = vpack.c.bf16 %v202_v27, %v201_v26 }
  0xc2   :  { %280 = vmatmul.bf16.vlgmr.msra.gmra.mxu1 %v203_v28 }
 0x13f   :  { %v281_v37 = vpop.f32.mrf.mxu1 }
 0x140   :  { %v282_v39 = vadd.f32 %v657_v38, %v281_v37 }
 0x142   :  { %v286_v42 = vmax.f32 %v282_v39, 0.0 }
 0x147   :  { %v283_v40 = vpop.f32.mrf.mxu1 }
 0x148   :  { %v284_v41 = vadd.f32 %v657_v38, %v283_v40 }
 0x14a   :  { %v287_v43 = vmax.f32 %v284_v41, 0.0 }
 0x14c   :  { %v288_v44 = vpack.c.bf16 %v287_v43, %v286_v42 }
 0x14e   :  { %365 = vmatmul.bf16.vlgmr.msra.gmra.mxu2 %v288_v44 }
 0x1d1   :  { %v366_v49 = vpop.f32.mrf.mxu2 }
 0x1d2   :  { %v367_v51 = vadd.f32 %v658_v50, %v366_v49 }
 0x1d4   :  { %v371_v54 = vmax.f32 %v367_v51, 0.0 }
 0x1d9   :  { %v368_v52 = vpop.f32.mrf.mxu2 }
 0x1da   :  { %v369_v53 = vadd.f32 %v658_v50, %v368_v52 }
 0x1dc   :  { %v372_v55 = vmax.f32 %v369_v53, 0.0 }
 0x1de   :  { %v373_v56 = vpack.c.bf16 %v372_v55, %v371_v54 }
 0x1e0   :  { %450 = vmatmul.bf16.vlgmr.msra.gmra.mxu3 %v373_v56 }
 0x263   :  { %v451_v58 = vpop.f32.mrf.mxu3 }
 0x264   :  { %v452_v59 = vadd.f32 %v659_v57, %v451_v58 }
 0x266   :  { %v456_v60 = vmax.f32 %v452_v59, 0.0 }
 0x268   :  { %458 = vst [vmem:[#allocation11] sm:$0xff] %v456_v60 }
 0x26b   :  { %v453_v61 = vpop.f32.mrf.mxu3 }
 0x26c   :  { %v454_v62 = vadd.f32 %v659_v57, %v453_v61 }
 0x26e   :  { %v457_v63 = vmax.f32 %v454_v62, 0.0 }
 0x270   :  { %459 = vst [vmem:[#allocation11 + $0x8] sm:$0xff] %v457_v63 }
 0x271   :  { %472 = dma.vmem_to_hbm [thread:$0]  %s465_s17, 256, %s467_s6, [#allocation4], %s820_s20, %s820_s20, %s821_s21  }
 0x272   :  { %810 = dma.done.wait [#allocation4], 256  }
 0x273   :  { %811 = vsyncadd [#allocation4], 4294967040 }
 0x274   :  { %477 = vsyncpa [#allocation3], 1 }
 0x275   :  { %478 = vsyncpa [#allocation6], 1 }
 0x276   :  { %479 = vsyncpa [#allocation9], 1 }
 0x277   :  { %480 = vsyncpa [#allocation4], 1 }

// kernel: tpu_custom_call.1
= control target key start
LH: loop header
LB: loop body
LE: loop exit
PB: predicated region body
PF: predicated region fallthrough
CT: control target
= control target key end

     0   :  { %14 = vsyncpa [#allocation3], 0  ;;  %s902_s0 = inlined_call_operand.hbm [shape: bf16[16,128], index: 0, kind: input, shape index: {}]   ;;  %s903_s1 = inlined_call_operand.hbm [shape: bf16[128,128], index: 1, kind: input, shape index: {}]   ;;  %s904_s2 = inlined_call_operand.vmem [shape: f32[1,128], index: 2, kind: input, shape index: {}]   ;;  %s905_s3 = inlined_call_operand.hbm [shape: bf16[128,128], index: 3, kind: input, shape index: {}]   ;;  %s906_s4 = inlined_call_operand.vmem [shape: f32[1,128], index: 4, kind: input, shape index: {}]   ;;  %s907_s5 = inlined_call_operand.hbm [shape: bf16[128,128], index: 5, kind: input, shape index: {}]   ;;  %s908_s6 = inlined_call_operand.vmem [shape: f32[1,128], index: 6, kind: input, shape index: {}]   ;;  %s909_s7 = inlined_call_operand.hbm [shape: bf16[128,128], index: 7, kind: input, shape index: {}]   ;;  %s910_s8 = inlined_call_operand.vmem [shape: f32[1,128], index: 8, kind: input, shape index: {}]   ;;  %s911_s9 = inlined_call_operand.hbm [shape: f32[16,128], index: 9, kind: output, shape index: {}]  }
   0x1   :  { %15 = vsyncpa [#allocation6], 0 }
   0x2   :  { %16 = vsyncpa [#allocation9], 0 }
   0x3   :  { %17 = vsyncpa [#allocation4], 0  ;;  %s35_s11 = sshll.u32 %s903_s1, 4  ;;  %s812_s12 = smov [#allocation5]   ;;  %s36_s11 = int_to_ptr.hbm [resolvable:$true] %s35_s11 }
   0x4   :  { %s37_s13 = sshll.u32 %s812_s12, 4  ;;  %s65_s16 = sshll.u32 %s907_s5, 4  ;;  %s38_s13 = int_to_ptr.vmem [resolvable:$true] %s37_s13  ;;  %s66_s16 = int_to_ptr.hbm [resolvable:$true] %s65_s16 }
   0x5   :  { %s813_s17 = smov 64   ;;  %s814_s18 = smov 4  }
   0x6   :  { %43 = dma.hbm_to_vmem [thread:$0]  %s36_s11, 1024, %s38_s13, [#allocation6], %s813_s17, %s813_s17, %s814_s18  }
   0x7   :  { %s815_s19 = smov [#allocation8]   ;;  %s22_s23 = sshll.u32 %s902_s0, 4  ;;  %s23_s23 = int_to_ptr.hbm [resolvable:$true] %s22_s23 }
   0x8   :  { %s67_s20 = sshll.u32 %s815_s19, 4  ;;  %s50_s25 = sshll.u32 %s905_s3, 4  ;;  %s68_s20 = int_to_ptr.vmem [resolvable:$true] %s67_s20  ;;  %s51_s25 = int_to_ptr.hbm [resolvable:$true] %s50_s25 }
   0x9   :  { %73 = dma.hbm_to_vmem [thread:$0]  %s66_s16, 1024, %s68_s20, [#allocation9], %s813_s17, %s813_s17, %s814_s18  }
   0xa   :  { %s816_s26 = smov [#allocation2]   ;;  %s817_s5 = smov [#allocation7]  }
   0xb   :  { %s24_s27 = sshll.u32 %s816_s26, 4  ;;  %s52_s28 = sshll.u32 %s817_s5, 4  ;;  %s25_s27 = int_to_ptr.vmem [resolvable:$true] %s24_s27  ;;  %s53_s28 = int_to_ptr.vmem [resolvable:$true] %s52_s28 }
   0xc   :  { %30 = dma.hbm_to_vmem [thread:$0]  %s23_s23, 128, %s25_s27, [#allocation3], %s813_s17, %s813_s17, %s814_s18  }
   0xd   :  { %s80_s10 = sshll.u32 %s909_s7, 4  ;;  %s818_s0 = smov [#allocation10]   ;;  %s81_s10 = int_to_ptr.hbm [resolvable:$true] %s80_s10 }
   0xe   :  { %58 = dma.hbm_to_vmem [thread:$0]  %s51_s25, 1024, %s53_s28, [#allocation6], %s813_s17, %s813_s17, %s814_s18  }
   0xf   :  { %s82_s11 = sshll.u32 %s818_s0, 4  ;;  %s83_s11 = int_to_ptr.vmem [resolvable:$true] %s82_s11 }
  0x10   :  { %88 = dma.hbm_to_vmem [thread:$0]  %s81_s10, 1024, %s83_s11, [#allocation9], %s813_s17, %s813_s17, %s814_s18  }
  0x11   :  { %804 = dma.done.wait [#allocation3], 128  }
  0x12   :  { %805 = vsyncadd [#allocation3], 4294967168 }
  0x13   :  { %806 = dma.done.wait [#allocation6], 2048  }
  0x14   :  { %807 = vsyncadd [#allocation6], 4294965248 }
  0x15   :  { %808 = dma.done.wait [#allocation9], 2048  }
  0x16   :  { %809 = vsyncadd [#allocation9], 4294965248  ;;  %v621_v0 = vld [vmem:[#allocation5 + $0x38] sm:$0xff]  ;;  %v620_v1 = vld [vmem:[#allocation5 + $0x30] sm:$0xff]  ;;  %s819_s16 = smov [#allocation11]   ;;  %s820_s20 = smov 128  }
  0x17   :  { %187 = vmatpush.bf16.msra.mxu0 %v621_v0  ;;  %v629_v2 = vld [vmem:[#allocation7 + $0x38] sm:$0xff]  ;;  %v628_v3 = vld [vmem:[#allocation7 + $0x30] sm:$0xff]  ;;  %v619_v4 = vld [vmem:[#allocation5 + $0x28] sm:$0xff]  ;;  %s464_s17 = sshll.u32 %s819_s16, 4  ;;  %s821_s21 = smov 8   ;;  %s465_s17 = int_to_ptr.vmem [resolvable:$true] %s464_s17 }
  0x18   :  { %272 = vmatpush.bf16.msra.mxu1 %v629_v2  ;;  %v627_v5 = vld [vmem:[#allocation7 + $0x28] sm:$0xff]  ;;  %v618_v6 = vld [vmem:[#allocation5 + $0x20] sm:$0xff]  ;;  %v617_v8 = vld [vmem:[#allocation5 + $0x18] sm:$0xff] }
  0x19   :  { %v626_v7 = vld [vmem:[#allocation7 + $0x20] sm:$0xff]  ;;  %v616_v9 = vld [vmem:[#allocation5 + $0x10] sm:$0xff]  ;;  %v615_v10 = vld [vmem:[#allocation5 + $0x8] sm:$0xff] }
  0x1a   :  { %v614_v11 = vld [vmem:[#allocation5] sm:$0xff]  ;;  %v613_v12 = vld [vmem:[#allocation2] sm:$0xff]  ;;  %v624_v14 = vld [vmem:[#allocation7 + $0x10] sm:$0xff] }
  0x1b   :  { %188 = vmatpush.bf16.msra.mxu0 %v620_v1  ;;  %v625_v13 = vld [vmem:[#allocation7 + $0x18] sm:$0xff]  ;;  %v623_v15 = vld [vmem:[#allocation7 + $0x8] sm:$0xff]  ;;  %v622_v16 = vld [vmem:[#allocation7] sm:$0xff] }
  0x1c   :  { %273 = vmatpush.bf16.msra.mxu1 %v628_v3  ;;  %v637_v17 = vld [vmem:[#allocation8 + $0x38] sm:$0xff]  ;;  %v636_v18 = vld [vmem:[#allocation8 + $0x30] sm:$0xff]  ;;  %v635_v19 = vld [vmem:[#allocation8 + $0x28] sm:$0xff] }
  0x1d   :  { %357 = vmatpush.bf16.msra.mxu2 %v637_v17  ;;  %v634_v20 = vld [vmem:[#allocation8 + $0x20] sm:$0xff]  ;;  %v656_v22 = vld [vmem:[%s904_s2] ss:$0 sm:$0xff]  ;;  %v632_v30 = vld [vmem:[#allocation8 + $0x10] sm:$0xff] }
  0x1e   :  { %v633_v29 = vld [vmem:[#allocation8 + $0x18] sm:$0xff]  ;;  %v631_v31 = vld [vmem:[#allocation8 + $0x8] sm:$0xff]  ;;  %v630_v32 = vld [vmem:[#allocation8] sm:$0xff] }
  0x1f   :  { %189 = vmatpush.bf16.msra.mxu0 %v619_v4  ;;  %v645_v33 = vld [vmem:[#allocation10 + $0x38] sm:$0xff]  ;;  %v644_v34 = vld [vmem:[#allocation10 + $0x30] sm:$0xff]  ;;  %v643_v35 = vld [vmem:[#allocation10 + $0x28] sm:$0xff] }
  0x20   :  { %274 = vmatpush.bf16.msra.mxu1 %v627_v5  ;;  %442 = vmatpush.bf16.msra.mxu3 %v645_v33  ;;  %v642_v36 = vld [vmem:[#allocation10 + $0x20] sm:$0xff]  ;;  %v657_v38 = vld [vmem:[%s906_s4] ss:$0 sm:$0xff]  ;;  %v640_v46 = vld [vmem:[#allocation10 + $0x10] sm:$0xff] }
  0x21   :  { %358 = vmatpush.bf16.msra.mxu2 %v636_v18  ;;  %v641_v45 = vld [vmem:[#allocation10 + $0x18] sm:$0xff]  ;;  %v639_v47 = vld [vmem:[#allocation10 + $0x8] sm:$0xff]  ;;  %v638_v48 = vld [vmem:[#allocation10] sm:$0xff] }
  0x22   :  { %v658_v50 = vld [vmem:[%s908_s6] ss:$0 sm:$0xff]  ;;  %s466_s6 = sshll.u32 %s911_s9, 4  ;;  %s467_s6 = int_to_ptr.hbm [resolvable:$true] %s466_s6 }
  0x23   :  { %190 = vmatpush.bf16.msra.mxu0 %v618_v6  ;;  %v659_v57 = vld [vmem:[%s910_s8] ss:$0 sm:$0xff] }
  0x24   :  { %275 = vmatpush.bf16.msra.mxu1 %v626_v7  ;;  %443 = vmatpush.bf16.msra.mxu3 %v644_v34 }
  0x25   :  { %359 = vmatpush.bf16.msra.mxu2 %v635_v19 }
  0x27   :  { %191 = vmatpush.bf16.msra.mxu0 %v617_v8 }
  0x28   :  { %276 = vmatpush.bf16.msra.mxu1 %v625_v13  ;;  %444 = vmatpush.bf16.msra.mxu3 %v643_v35 }
  0x29   :  { %360 = vmatpush.bf16.msra.mxu2 %v634_v20 }
  0x2b   :  { %192 = vmatpush.bf16.msra.mxu0 %v616_v9 }
  0x2c   :  { %277 = vmatpush.bf16.msra.mxu1 %v624_v14  ;;  %445 = vmatpush.bf16.msra.mxu3 %v642_v36 }
  0x2d   :  { %361 = vmatpush.bf16.msra.mxu2 %v633_v29 }
  0x2f   :  { %193 = vmatpush.bf16.msra.mxu0 %v615_v10 }
  0x30   :  { %278 = vmatpush.bf16.msra.mxu1 %v623_v15  ;;  %446 = vmatpush.bf16.msra.mxu3 %v641_v45 }
  0x31   :  { %362 = vmatpush.bf16.msra.mxu2 %v632_v30 }
  0x33   :  { %194 = vmatpush.bf16.msra.mxu0 %v614_v11 }
  0x34   :  { %279 = vmatpush.bf16.msra.mxu1 %v622_v16  ;;  %447 = vmatpush.bf16.msra.mxu3 %v640_v46 }
  0x35   :  { %363 = vmatpush.bf16.msra.mxu2 %v631_v31 }
  0x36   :  { %195 = vmatmul.bf16.vlgmr.msra.gmra.mxu0 %v613_v12 }
  0x38   :  { %448 = vmatpush.bf16.msra.mxu3 %v639_v47 }
  0x39   :  { %364 = vmatpush.bf16.msra.mxu2 %v630_v32 }
  0x3c   :  { %449 = vmatpush.bf16.msra.mxu3 %v638_v48 }
  0xb3   :  { %v196_v21 = vpop.f32.mrf.mxu0 }
  0xb4   :  { %v197_v23 = vadd.f32 %v656_v22, %v196_v21 }
  0xb6   :  { %v201_v26 = vmax.f32 %v197_v23, 0.0 }
  0xbb   :  { %v198_v24 = vpop.f32.mrf.mxu0 }
  0xbc   :  { %v199_v25 = vadd.f32 %v656_v22, %v198_v24 }
  0xbe   :  { %v202_v27 = vmax.f32 %v199_v25, 0.0 }
  0xc0   :  { %v203_v28 = vpack.c.bf16 %v202_v27, %v201_v26 }
  0xc2   :  { %280 = vmatmul.bf16.vlgmr.msra.gmra.mxu1 %v203_v28 }
 0x13f   :  { %v281_v37 = vpop.f32.mrf.mxu1 }
 0x140   :  { %v282_v39 = vadd.f32 %v657_v38, %v281_v37 }
 0x142   :  { %v286_v42 = vmax.f32 %v282_v39, 0.0 }
 0x147   :  { %v283_v40 = vpop.f32.mrf.mxu1 }
 0x148   :  { %v284_v41 = vadd.f32 %v657_v38, %v283_v40 }
 0x14a   :  { %v287_v43 = vmax.f32 %v284_v41, 0.0 }
 0x14c   :  { %v288_v44 = vpack.c.bf16 %v287_v43, %v286_v42 }
 0x14e   :  { %365 = vmatmul.bf16.vlgmr.msra.gmra.mxu2 %v288_v44 }
 0x1d1   :  { %v366_v49 = vpop.f32.mrf.mxu2 }
 0x1d2   :  { %v367_v51 = vadd.f32 %v658_v50, %v366_v49 }
 0x1d4   :  { %v371_v54 = vmax.f32 %v367_v51, 0.0 }
 0x1d9   :  { %v368_v52 = vpop.f32.mrf.mxu2 }
 0x1da   :  { %v369_v53 = vadd.f32 %v658_v50, %v368_v52 }
 0x1dc   :  { %v372_v55 = vmax.f32 %v369_v53, 0.0 }
 0x1de   :  { %v373_v56 = vpack.c.bf16 %v372_v55, %v371_v54 }
 0x1e0   :  { %450 = vmatmul.bf16.vlgmr.msra.gmra.mxu3 %v373_v56 }
 0x263   :  { %v451_v58 = vpop.f32.mrf.mxu3 }
 0x264   :  { %v452_v59 = vadd.f32 %v659_v57, %v451_v58 }
 0x266   :  { %v456_v60 = vmax.f32 %v452_v59, 0.0 }
 0x268   :  { %458 = vst [vmem:[#allocation11] sm:$0xff] %v456_v60 }
 0x26b   :  { %v453_v61 = vpop.f32.mrf.mxu3 }
 0x26c   :  { %v454_v62 = vadd.f32 %v659_v57, %v453_v61 }
 0x26e   :  { %v457_v63 = vmax.f32 %v454_v62, 0.0 }
 0x270   :  { %459 = vst [vmem:[#allocation11 + $0x8] sm:$0xff] %v457_v63 }
 0x271   :  { %472 = dma.vmem_to_hbm [thread:$0]  %s465_s17, 256, %s467_s6, [#allocation4], %s820_s20, %s820_s20, %s821_s21  }
 0x272   :  { %810 = dma.done.wait [#allocation4], 256  }
 0x273   :  { %811 = vsyncadd [#allocation4], 4294967040 }
 0x274   :  { %477 = vsyncpa [#allocation3], 1 }
 0x275   :  { %478 = vsyncpa [#allocation6], 1 }
 0x276   :  { %479 = vsyncpa [#allocation9], 1 }
 0x277   :  { %480 = vsyncpa [#allocation4], 1 }

</bundles_post_ra>
